<compile_context>
chip_gen: v5e
topology: v5e:2x2
jax: 0.10.0
libtpu: 0.0.40
codegen_flags: <defaults>
</compile_context>

<pallas_src>
import functools

import jax
import jax.numpy as jnp
from jax.experimental import pallas as pl
from jax.experimental.pallas import tpu as pltpu


def _pe_add_kernel(x_ref, pe_ref, o_ref):
    # x_ref / o_ref: (nb, tm, C) lane-dense tile spanning nb batch elements.
    # pe_ref:        (1,  tm, C) matching tile of the broadcast positional
    #                encoding; broadcast over the folded-batch dim is VPU work,
    #                which is free in this DMA-bound kernel.
    o_ref[...] = x_ref[...] + pe_ref[...]


def _pick_lane_width(n):
    """Largest lane-dense width (multiple of 128) that divides n, else None."""
    for c in (1024, 512, 256, 128):
        if n % c == 0:
            return c
    return None


@functools.lru_cache(maxsize=1)
def _generation_config():
    """Per-TPU-generation tiling / dispatch knobs (trace-time, best effort)."""
    kind = ""
    vmem_cap = 128 << 20
    try:
        kind = jax.devices()[0].device_kind.lower()
    except Exception:
        pass
    try:
        # Best-effort physical VMEM query; field name guarded for robustness.
        cap = getattr(pltpu.get_tpu_info(), "vmem_capacity_bytes", None)
        if cap:
            vmem_cap = int(cap)
    except Exception:
        if "v7" in kind:
            vmem_cap = 64 << 20

    if "v7" in kind:
        # 64 MiB/TC VMEM and ~3.2 TB/s HBM: modest blocks, high XLA cutover.
        block_bytes, min_pallas_bytes = 4 << 20, 16 << 20
    elif "v6" in kind:
        # 128 MiB VMEM: bigger blocks cut grid-step count (measured 63%->86%
        # of HBM roofline going small -> large tiles).
        block_bytes, min_pallas_bytes = 8 << 20, 8 << 20
    else:
        # v5e / v5p / v4 / unknown: conservative defaults (v5e default scoped
        # VMEM is only 16 MiB, so the raised vmem_limit below matters).
        block_bytes, min_pallas_bytes = 4 << 20, 4 << 20

    # Live pipeline set = 2x(in) + 2x(out) + 2x(pe) blocks <= 6*block_bytes.
    # Keep the scoped limit above that with headroom for compiler scratch,
    # but never more than ~3/4 of physical VMEM (v7x: 48 MiB, others: 64 MiB).
    vmem_limit_bytes = int(max(32 << 20, min(3 * vmem_cap // 4, 64 << 20)))
    return {
        "block_bytes": block_bytes,
        "min_pallas_bytes": min_pallas_bytes,
        "vmem_limit_bytes": vmem_limit_bytes,
    }


@functools.partial(jax.jit, static_argnames=("wn_s", "wn_e", "force_pallas"))
def learned_positional_encoder(x, pe_layer, wn_s, wn_e, *, force_pallas=False):
    """JAX/Pallas equivalent of Learned_PositionalEncoder.forward.

    x:        (b, t, d) array
    pe_layer: (max_len,) learned positional-encoding parameter
    wn_s, wn_e: static window bounds; requires wn_e - wn_s == t
    """
    b, t, d = x.shape
    assert wn_e - wn_s == t, "positional window length must match sequence length"

    pe_win = pe_layer[wn_s:wn_e].astype(x.dtype)          # (t,)
    itemsize = x.dtype.itemsize
    total_bytes = b * t * d * itemsize

    cfg = _generation_config()
    C = _pick_lane_width(t * d)

    # Tiny problems (or shapes we cannot make lane-dense): plain XLA broadcast add.
    # TODO(synk): padded / lane-masked Pallas path for t*d % 128 != 0 so large
    # tensors with odd t stay off the masked-store slow path.
    if C is None or (not force_pallas and total_bytes < cfg["min_pallas_bytes"]):
        return x + pe_win.reshape(1, t, 1)

    M = (t * d) // C                                      # rows of flattened view
    sub = max(8, 32 // itemsize)                          # sublane multiple: 8 f32, 16 bf16
    row_bytes = C * itemsize
    target = cfg["block_bytes"]

    tm_cap = max(1, target // row_bytes)
    if tm_cap >= M:
        tm = M                                            # full dim: always legal
    else:
        tm = min(M, max(sub, (tm_cap // sub) * sub))
    # Fold batch elements into the block when the per-batch m-slab is small so
    # the block stays at the per-generation target size (per-grid-step overhead
    # amortized regardless of shape).
    nb = int(max(1, min(b, target // (tm * row_bytes))))
    grid = (pl.cdiv(M, tm), pl.cdiv(b, nb))               # batch innermost -> pe reuse

    # Lane-dense views; pe is broadcast over d once in the wrapper (t*d elements,
    # <= 1/b of the x stream).  pe's block index depends only on the m tile, so
    # with the batch axis innermost it is re-fetched just once per m tile; its
    # double buffer is accounted for in the VMEM budget above.
    x3 = x.reshape(b, M, C)
    pe3 = jnp.broadcast_to(pe_win[:, None], (t, d)).reshape(1, M, C)

    out = pl.pallas_call(
        _pe_add_kernel,
        out_shape=jax.ShapeDtypeStruct((b, M, C), x.dtype),
        grid_spec=pltpu.PrefetchScalarGridSpec(
            num_scalar_prefetch=0,
            grid=grid,                                    # (m tiles, batch blocks)
            in_specs=[
                pl.BlockSpec((nb, tm, C), lambda m, ib: (ib, m, 0)),  # x tile
                pl.BlockSpec((1, tm, C), lambda m, ib: (0, m, 0)),    # pe tile (batch-invariant)
            ],
            out_specs=pl.BlockSpec((nb, tm, C), lambda m, ib: (ib, m, 0)),
        ),
        compiler_params=pltpu.CompilerParams(
            dimension_semantics=("parallel", "parallel"),
            vmem_limit_bytes=cfg["vmem_limit_bytes"],
        ),
        cost_estimate=pl.CostEstimate(
            flops=b * t * d,
            transcendentals=0,
            bytes_accessed=2 * total_bytes + t * d * itemsize,
        ),
    )(x3, pe3)
    return out.reshape(b, t, d)


if __name__ == "__main__":
    key = jax.random.PRNGKey(0)

    def run_case(b, t, d, wn_s, wn_e, max_len, k):
        kx, kp = jax.random.split(k)
        x = jax.random.normal(kx, (b, t, d), dtype=jnp.float32)
        pe_layer = jax.random.normal(kp, (max_len,), dtype=jnp.float32)
        # Reference (mirrors the PyTorch broadcast semantics).
        ref = x + pe_layer[wn_s:wn_e].reshape(1, wn_e - wn_s, 1)
        out = jax.block_until_ready(
            learned_positional_encoder(x, pe_layer, wn_s, wn_e, force_pallas=True))
        assert out.shape == (b, t, d)
        assert jnp.allclose(out, ref, atol=1e-6), "Pallas path mismatch vs reference"
        return x, pe_layer, ref

    # Module-scale shapes: x.size() = (b, seq_len, dim_val), window inside max_len.
    x, pe_layer, ref = run_case(2, 8, 32, 2, 10, 16, jax.random.fold_in(key, 0))

    # Auto-dispatch path (tiny input -> plain XLA add), same semantics.
    out_auto = jax.block_until_ready(
        learned_positional_encoder(x, pe_layer, 2, 10))
    assert jnp.allclose(out_auto, ref, atol=1e-6), "fast path mismatch vs reference"

    # Batch-folded multi-step grid with a partial final batch block (nb | b fails).
    run_case(40, 1024, 64, 0, 1024, 1024, jax.random.fold_in(key, 1))

    # Per-batch slab larger than one block -> multiple m tiles along the grid.
    run_case(2, 4096, 320, 0, 4096, 4096, jax.random.fold_in(key, 2))

    print("KERNEL_OK")
</pallas_src>

<mosaic_0001>
module attributes {stable_mosaic.version = 11 : i64} {
  func.func @_pe_add_kernel(%arg0: i32, %arg1: i32, %arg2: memref<2x1x256xf32, #tpu.memory_space<vmem>>, %arg3: memref<1x1x256xf32, #tpu.memory_space<vmem>>, %arg4: memref<2x1x256xf32, #tpu.memory_space<vmem>>) attributes {dimension_semantics = [#tpu.dimension_semantics<parallel>, #tpu.dimension_semantics<parallel>], iteration_bounds = array<i64: 1, 1>, scalar_prefetch = 0 : i64, scratch_operands = 0 : i64, tpu.core_type = #tpu.core_type<tc>, window_params = [{transform_indices = @transform_0, window_bounds = array<i64: 2, 1, 256>}, {transform_indices = @transform_1, window_bounds = array<i64: 1, 1, 256>}, {transform_indices = @transform_2, window_bounds = array<i64: 2, 1, 256>}]} {
    %c0 = arith.constant 0 : index
    %c0_0 = arith.constant 0 : index
    %c0_1 = arith.constant 0 : index
    %0 = vector.load %arg2[%c0, %c0_0, %c0_1] : memref<2x1x256xf32, #tpu.memory_space<vmem>>, vector<2x1x256xf32>
    %c0_2 = arith.constant 0 : index
    %c0_3 = arith.constant 0 : index
    %c0_4 = arith.constant 0 : index
    %1 = vector.load %arg3[%c0_2, %c0_3, %c0_4] : memref<1x1x256xf32, #tpu.memory_space<vmem>>, vector<1x1x256xf32>
    %2 = vector.broadcast %1 : vector<1x1x256xf32> to vector<2x1x256xf32>
    %3 = arith.addf %0, %2 : vector<2x1x256xf32>
    %c0_5 = arith.constant 0 : index
    %c0_6 = arith.constant 0 : index
    %c0_7 = arith.constant 0 : index
    %4 = vector.load %arg4[%c0_5, %c0_6, %c0_7] : memref<2x1x256xf32, #tpu.memory_space<vmem>>, vector<2x1x256xf32>
    tpu.vector_store %arg4[%c0_5, %c0_6, %c0_7], %3 {strides = array<i32>} : memref<2x1x256xf32, #tpu.memory_space<vmem>>, vector<2x1x256xf32>,
    return
  }
  func.func @transform_0(%arg0: i32, %arg1: i32) -> (i32, i32, i32) {
    %c0_i32 = arith.constant 0 : i32
    %c0_i32_0 = arith.constant 0 : i32
    return %arg1, %arg0, %c0_i32 : i32, i32, i32
  }
  func.func @transform_1(%arg0: i32, %arg1: i32) -> (i32, i32, i32) {
    %c0_i32 = arith.constant 0 : i32
    %c0_i32_0 = arith.constant 0 : i32
    %c0_i32_1 = arith.constant 0 : i32
    return %c0_i32, %arg0, %c0_i32_0 : i32, i32, i32
  }
  func.func @transform_2(%arg0: i32, %arg1: i32) -> (i32, i32, i32) {
    %c0_i32 = arith.constant 0 : i32
    %c0_i32_0 = arith.constant 0 : i32
    return %arg1, %arg0, %c0_i32 : i32, i32, i32
  }
}

</mosaic_0001>

<bundles_post_ra>
// kernel: learned_positional_encoder.1
= control target key start
LH: loop header
LB: loop body
LE: loop exit
PB: predicated region body
PF: predicated region fallthrough
CT: control target
= control target key end

     0   :  { %v16_v0 = vlaneseq  ;;  %s56_s0 = inlined_call_operand.vmem [shape: f32[2,1,256], index: 0, kind: input, shape index: {}]   ;;  %s57_s1 = inlined_call_operand.vmem [shape: f32[1,1,256], index: 1, kind: input, shape index: {}]   ;;  %s58_s2 = inlined_call_operand.vmem [shape: f32[2,1,256], index: 2, kind: output, shape index: {}]  }
   0x1   :  { %v11_v1 = vld [vmem:[%s56_s0] sm:$0x3]  ;;  %v12_v3 = vld [vmem:[%s56_s0 + $0x2] sm:$0x3] }
   0x2   :  { %v13_v2 = vld [vmem:[%s57_s1] sm:$0x3]  ;;  %vm18_vm0 = vcmp.lt.s32.totalorder %v16_v0, 256 }
   0x3   :  { %v14_v4 = vadd.f32 %v13_v2, %v11_v1  ;;  %v15_v5 = vadd.f32 %v13_v2, %v12_v3 }
   0x5   :  { %20 = vst.msk [vmem:[%s58_s2] sm:$0x3] %vm18_vm0, %v14_v4 }
   0x6   :  { %21 = vst.msk [vmem:[%s58_s2 + $0x2] sm:$0x3] %vm18_vm0, %v15_v5 }

</bundles_post_ra>
